<compile_context>
chip_gen: v7x
topology: tpu7x:2x2x1
jax: 0.10.0
libtpu: 0.0.40
codegen_flags: <defaults>
</compile_context>

<pallas_src>
import math

import jax
import jax.numpy as jnp
from jax.experimental import pallas as pl
from jax.experimental.pallas import tpu as pltpu


def _copy_kernel(x_ref, o_ref):
    # Pure pass-through: load the current VMEM tile and store it to the output.
    o_ref[...] = x_ref[...]


# Sub-32-bit dtypes pack along sublanes: f32 -> 8, bf16 -> 16, int8/fp8 -> 32.
_SUBLANE_MULT = {4: 8, 2: 16, 1: 32}


def _round_up(n: int, m: int) -> int:
    return ((n + m - 1) // m) * m


def _budgets():
    """(block_bytes_cap, vmem_limit_bytes) picked per TPU generation."""
    try:
        phys_vmem = int(pltpu.get_tpu_info().vmem_capacity_bytes)
    except Exception:
        phys_vmem = 64 << 20  # conservative default (v7x per-TensorCore VMEM)
    if phys_vmem >= (128 << 20):
        # v5e / v6e: 128 MiB physical VMEM -> 8 MiB blocks, raise scoped limit.
        return 8 << 20, 64 << 20
    # v7x: 64 MiB physical VMEM -> 4 MiB blocks, keep scoped limit modest.
    return 4 << 20, 32 << 20


def _identity_copy_pallas(x: jax.Array) -> jax.Array:
    """Identity implemented as a tiled, lane-dense VMEM copy."""
    shape, dtype = x.shape, x.dtype
    total = math.prod(shape) if shape else 1
    itemsize = jnp.dtype(dtype).itemsize
    sub = _SUBLANE_MULT.get(itemsize, 8)

    block_bytes, vmem_limit = _budgets()
    cparams = pltpu.CompilerParams(
        dimension_semantics=("parallel",),
        vmem_limit_bytes=vmem_limit,
    )

    if total % 128 == 0:
        # Lane-dense 2D view: last dim a multiple of 128 -> full-width vst.
        lane_cols = next(c for c in (1024, 512, 256, 128) if total % c == 0)
        rows = total // lane_cols
        x2d = x.reshape(rows, lane_cols)

        # Largest dtype-aware tile under the per-generation byte cap.
        cap_rows = max(sub, (block_bytes // (lane_cols * itemsize)) // sub * sub)
        # >=2 grid steps whenever rows allow it (lets v7x's two TCs split the
        # copy) while keeping double-buffered in+out within the VMEM budget.
        tile_rows = min(cap_rows, max(sub, _round_up(pl.cdiv(rows, 2), sub)))
        grid = (pl.cdiv(rows, tile_rows),)  # ragged last block handled by Pallas

        out2d = pl.pallas_call(
            _copy_kernel,
            out_shape=jax.ShapeDtypeStruct((rows, lane_cols), dtype),
            grid_spec=pltpu.PrefetchScalarGridSpec(
                num_scalar_prefetch=0,
                grid=grid,
                in_specs=[pl.BlockSpec((tile_rows, lane_cols), lambda i: (i, 0))],
                out_specs=pl.BlockSpec((tile_rows, lane_cols), lambda i: (i, 0)),
            ),
            compiler_params=cparams,
            # Always alias: value-safe (output == input) and avoids a second
            # full-size HBM buffer when donation is possible.
            input_output_aliases={0: 0},
        )(x2d)
        return out2d.reshape(shape)

    # Fallback (element count not a multiple of 128): tile a (1, total) view
    # along the lane axis with a ragged last block — never a whole-array VMEM
    # block, so large odd-sized arrays still compile on 64-MiB-VMEM chips.
    tile_cols = min(_round_up(total, 128), 32768)
    grid = (pl.cdiv(total, tile_cols),)
    x2d = x.reshape(1, total)
    out2d = pl.pallas_call(
        _copy_kernel,
        out_shape=jax.ShapeDtypeStruct((1, total), dtype),
        grid_spec=pltpu.PrefetchScalarGridSpec(
            num_scalar_prefetch=0,
            grid=grid,
            in_specs=[pl.BlockSpec((1, tile_cols), lambda i: (0, i))],
            out_specs=pl.BlockSpec((1, tile_cols), lambda i: (0, i)),
        ),
        compiler_params=cparams,
        input_output_aliases={0: 0},
    )(x2d)
    return out2d.reshape(shape)


def base_model_forward(x: jax.Array, *, force_kernel: bool = False) -> jax.Array:
    """BaseModel.forward stand-in (identity).

    By default this returns `x` directly — the optimal identity moves zero
    bytes of HBM traffic.  Pass `force_kernel=True` to route through the
    Pallas tiled-copy kernel (e.g. to exercise the TPU kernel plumbing).
    """
    if x.size == 0:
        return x
    if not force_kernel:
        return x
    return _identity_copy_pallas(x)


if __name__ == "__main__":
    key = jax.random.PRNGKey(0)
    # Small NCHW input consistent with a generic vision-style forward.
    x = jax.random.normal(key, (2, 4, 16, 16), dtype=jnp.float32)

    # Default forward: identity short-circuit (zero HBM traffic).
    y0 = base_model_forward(x)
    jax.block_until_ready(y0)
    assert y0.shape == x.shape and y0.dtype == x.dtype

    # Explicitly exercise the Pallas copy kernel.
    y = base_model_forward(x, force_kernel=True)
    jax.block_until_ready(y)

    # Sanity check: identity semantics.
    assert y.shape == x.shape and y.dtype == x.dtype
    assert bool(jnp.allclose(y, x))
    assert bool(jnp.allclose(y0, x))

    print("KERNEL_OK")
</pallas_src>

<mosaic_0001>
module attributes {stable_mosaic.version = 11 : i64} {
  func.func @_copy_kernel(%arg0: i32, %arg1: memref<8x1024xf32, #tpu.memory_space<vmem>>, %arg2: memref<8x1024xf32, #tpu.memory_space<vmem>>) attributes {dimension_semantics = [#tpu.dimension_semantics<parallel>], iteration_bounds = array<i64: 1>, scalar_prefetch = 0 : i64, scratch_operands = 0 : i64, tpu.core_type = #tpu.core_type<tc>, window_params = [{transform_indices = @transform_0, window_bounds = array<i64: 8, 1024>}, {transform_indices = @transform_1, window_bounds = array<i64: 8, 1024>}]} {
    %c0 = arith.constant 0 : index
    %c0_0 = arith.constant 0 : index
    %0 = vector.load %arg1[%c0, %c0_0] : memref<8x1024xf32, #tpu.memory_space<vmem>>, vector<8x1024xf32>
    %c0_1 = arith.constant 0 : index
    %c0_2 = arith.constant 0 : index
    %1 = vector.load %arg2[%c0_1, %c0_2] : memref<8x1024xf32, #tpu.memory_space<vmem>>, vector<8x1024xf32>
    tpu.vector_store %arg2[%c0_1, %c0_2], %0 {strides = array<i32>} : memref<8x1024xf32, #tpu.memory_space<vmem>>, vector<8x1024xf32>,
    return
  }
  func.func @transform_0(%arg0: i32) -> (i32, i32) {
    %c0_i32 = arith.constant 0 : i32
    %c0_i32_0 = arith.constant 0 : i32
    return %arg0, %c0_i32 : i32, i32
  }
  func.func @transform_1(%arg0: i32) -> (i32, i32) {
    %c0_i32 = arith.constant 0 : i32
    %c0_i32_0 = arith.constant 0 : i32
    return %arg0, %c0_i32 : i32, i32
  }
}

</mosaic_0001>

<bundles_post_ra>
// kernel: tpu_custom_call.1
= control target key start
LH: loop header
LB: loop body
LE: loop exit
PB: predicated region body
PF: predicated region fallthrough
CT: control target
= control target key end

     0   :  { %6 = vsyncpa [#allocation3], 0  ;;  %s152_s0 = inlined_call_operand.hbm [shape: f32[2,1024], index: 0, kind: input, shape index: {}, may-alias: {0,1}]   ;;  %s153_s1 = inlined_call_operand.hbm [shape: f32[2,1024], index: 1, kind: output, shape index: {}, may-alias: {0,1}]  }
   0x1   :  { %7 = vsyncpa [#allocation4], 0 }
   0x2   :  { %12 = vsyncadd [#allocation3], 768  ;;  %s108_s6 = smov [#allocation2]   ;;  %s60_s10 = scalar_lea.hbm %s152_s0, 256 }
   0x3   :  { %s13_s7 = sshll.u32 %s108_s6, 4  ;;  %p61_p0 = scmp.ne.s32.totalorder %s152_s0, %s60_s10  ;;  %s14_s7 = int_to_ptr.vmem [resolvable:$true] %s13_s7 }
   0x4   :  { %p64_p1 = scmp.lt.u32.totalorder %s60_s10, %s152_s0 }
   0x6   :  { %p66_p2 = pnand %p64_p1, %p61_p0 }
   0x8   :  { %69 = shalt.err (!%p66_p2)
}
   0x9   :  { %s70_s15 = scalar_lea.vmem %s14_s7, 256  ;;  %s74_s16 = scalar_lea.vmem %s14_s7, 1024 }
   0xa   :  { %p71_p3 = scmp.ne.s32.totalorder %s14_s7, %s70_s15  ;;  %p75_p4 = scmp.lt.s32.totalorder %s14_s7, %s14_s7 }
   0xb   :  { %p76_p5 = scmp.lt.s32.totalorder %s74_s16, %s70_s15 }
   0xd   :  { %p77_p6 = por %p76_p5, %p75_p4 }
   0xf   :  { %p78_p7 = pnand %p77_p6, %p71_p3 }
  0x11   :  { %81 = shalt.err (!%p78_p7)
}
  0x12   :  { %s109_s17 = smov 256   ;;  %s110_s18 = smov 16  }
  0x13   :  { %19 = dma.hbm_to_vmem [thread:$0]  %s152_s0, 256, %s14_s7, [#allocation3], %s109_s17, %s109_s17, %s110_s18  }
  0x14   :  { %104 = dma.done.wait [#allocation3], 1024  }
  0x15   :  { %105 = vsyncadd [#allocation3], 4294966272  ;;  %v23_v0 = vld [vmem:[#allocation2] sm:$0xff]  ;;  %v24_v1 = vld [vmem:[#allocation2 + $0x8] sm:$0xff] }
  0x16   :  { %v25_v2 = vld [vmem:[#allocation2 + $0x10] sm:$0xff]  ;;  %31 = vst [vmem:[#allocation5] sm:$0xff] %v23_v0  ;;  %32 = vst [vmem:[#allocation5 + $0x8] sm:$0xff] %v24_v1  ;;  %v26_v3 = vld [vmem:[#allocation2 + $0x18] sm:$0xff] }
  0x17   :  { %33 = vst [vmem:[#allocation5 + $0x10] sm:$0xff] %v25_v2  ;;  %v27_v4 = vld [vmem:[#allocation2 + $0x20] sm:$0xff]  ;;  %v28_v5 = vld [vmem:[#allocation2 + $0x28] sm:$0xff]  ;;  %34 = vst [vmem:[#allocation5 + $0x18] sm:$0xff] %v26_v3 }
  0x18   :  { %35 = vst [vmem:[#allocation5 + $0x20] sm:$0xff] %v27_v4  ;;  %36 = vst [vmem:[#allocation5 + $0x28] sm:$0xff] %v28_v5  ;;  %v29_v6 = vld [vmem:[#allocation2 + $0x30] sm:$0xff]  ;;  %v30_v7 = vld [vmem:[#allocation2 + $0x38] sm:$0xff] }
  0x19   :  { %37 = vst [vmem:[#allocation5 + $0x30] sm:$0xff] %v29_v6  ;;  %38 = vst [vmem:[#allocation5 + $0x38] sm:$0xff] %v30_v7 }
  0x1a   :  { %43 = vsyncadd [#allocation4], 768  ;;  %s111_s0 = smov [#allocation5]  }
  0x1b   :  { %s44_s21 = sshll.u32 %s111_s0, 4  ;;  %s45_s21 = int_to_ptr.vmem [resolvable:$true] %s44_s21 }
  0x1c   :  { %s82_s22 = scalar_lea.vmem %s45_s21, 256  ;;  %s86_s23 = scalar_lea.vmem %s45_s21, 1024 }
  0x1d   :  { %p83_p8 = scmp.ne.s32.totalorder %s45_s21, %s82_s22  ;;  %p87_p9 = scmp.lt.s32.totalorder %s45_s21, %s45_s21 }
  0x1e   :  { %p88_p10 = scmp.lt.s32.totalorder %s86_s23, %s82_s22 }
  0x20   :  { %p89_p11 = por %p88_p10, %p87_p9 }
  0x22   :  { %p90_p12 = pnand %p89_p11, %p83_p8 }
  0x24   :  { %93 = shalt.err (!%p90_p12)
}
  0x25   :  { %s94_s26 = scalar_lea.hbm %s153_s1, 256 }
  0x26   :  { %p95_p13 = scmp.ne.s32.totalorder %s153_s1, %s94_s26  ;;  %p98_p0 = scmp.lt.u32.totalorder %s94_s26, %s153_s1 }
  0x28   :  { %p100_p1 = pnand %p98_p0, %p95_p13 }
  0x2a   :  { %103 = shalt.err (!%p100_p1)
}
  0x2b   :  { %50 = dma.vmem_to_hbm [thread:$0]  %s45_s21, 256, %s153_s1, [#allocation4], %s109_s17, %s109_s17, %s110_s18  }
  0x2c   :  { %106 = dma.done.wait [#allocation4], 1024  }
  0x2d   :  { %107 = vsyncadd [#allocation4], 4294966272 }
  0x2e   :  { %54 = vsyncpa [#allocation3], 1 }
  0x2f   :  { %55 = vsyncpa [#allocation4], 1 }

</bundles_post_ra>
